<compile_context>
chip_gen: v5e
topology: v5e:2x2
jax: 0.10.0
libtpu: 0.0.40
codegen_flags: <defaults>
</compile_context>

<pallas_src>
import functools

import jax
import jax.numpy as jnp
from jax.experimental import pallas as pl
from jax.experimental.pallas import tpu as pltpu

IN_FEATURES = 11
HIDDEN = 256
OUT_FEATURES = 3
OUT_W = 8                 # zero-padded output width (== full array last dim)
MAX_BATCH_BLOCK = 4096    # rows per grid step
MIN_PALLAS_BATCH = 256    # below this, plain jnp beats kernel launch + DMA


def _round_up(x, m):
    return ((x + m - 1) // m) * m


def _mlp_kernel(x_ref, w1_ref, b1_ref, w2_ref, b2_ref, o_ref):
    # One batch tile per grid step; weights/biases are VMEM-resident
    # (constant index_map), so only x/out stream from/to HBM.
    x = x_ref[...]                                                    # (TB, 11)
    h = jnp.dot(x, w1_ref[...],
                preferred_element_type=jnp.float32) + b1_ref[...]     # (TB, 256)
    h = jnp.maximum(h, 0.0)                                           # ReLU (f32)
    out = jnp.dot(h, w2_ref[...],
                  preferred_element_type=jnp.float32) + b2_ref[...]   # (TB, 8)
    o_ref[...] = out.astype(o_ref.dtype)


def prepare_params(w1, b1, w2, b2):
    """One-time parameter prep (call once, outside the per-call forward):
    zero-pad the second layer 3 -> OUT_W lanes and make b1 2-D."""
    w2p = jnp.pad(w2, ((0, 0), (0, OUT_W - OUT_FEATURES)))
    b2p = jnp.pad(b2.reshape(1, OUT_FEATURES),
                  ((0, 0), (0, OUT_W - OUT_FEATURES)))
    return w1, b1.reshape(1, HIDDEN), w2p, b2p


@functools.partial(jax.jit, static_argnames=("block_b", "min_pallas_batch"))
def neural_network_q_forward(x, w1, b1_2d, w2p, b2p, *,
                             block_b=MAX_BATCH_BLOCK,
                             min_pallas_batch=MIN_PALLAS_BATCH):
    """x: (B, 11) float32 -> (B, 3) float32.  Params from prepare_params."""
    B = x.shape[0]

    # Tiny-batch bypass: the Pallas path is pure launch + DMA latency there.
    if B < min_pallas_batch:
        h = jnp.maximum(x @ w1 + b1_2d, 0.0)
        return (h @ w2p + b2p)[:, :OUT_FEATURES]

    # Pad batch only to a sublane multiple; the ragged last grid block is
    # clipped by Pallas (no cross-row reduction, so junk rows are harmless
    # and sliced off below).
    b_pad = _round_up(B, 8)
    if b_pad != B:
        x = jnp.pad(x, ((0, b_pad - B), (0, 0)))

    # Tile: ~half the padded batch (>= 2 balanced blocks so both v7x
    # TensorCores work), capped at block_b, sublane-aligned.
    tb = min(block_b, max(8, _round_up(pl.cdiv(b_pad, 2), 8)))
    num_blocks = pl.cdiv(b_pad, tb)

    flops = 2 * b_pad * (IN_FEATURES * HIDDEN + HIDDEN * OUT_W)
    bytes_accessed = 4 * (
        b_pad * IN_FEATURES                 # x
        + IN_FEATURES * HIDDEN + HIDDEN     # w1, b1
        + HIDDEN * OUT_W + OUT_W            # w2p, b2p
        + b_pad * OUT_W                     # out
    )

    out_padded = pl.pallas_call(
        _mlp_kernel,
        out_shape=jax.ShapeDtypeStruct((b_pad, OUT_W), jnp.float32),
        grid=(num_blocks,),
        in_specs=[
            pl.BlockSpec((tb, IN_FEATURES), lambda i: (i, 0)),      # x: batch-tiled
            pl.BlockSpec((IN_FEATURES, HIDDEN), lambda i: (0, 0)),  # w1: resident
            pl.BlockSpec((1, HIDDEN), lambda i: (0, 0)),            # b1: resident
            pl.BlockSpec((HIDDEN, OUT_W), lambda i: (0, 0)),        # w2p: resident
            pl.BlockSpec((1, OUT_W), lambda i: (0, 0)),             # b2p: resident
        ],
        out_specs=pl.BlockSpec((tb, OUT_W), lambda i: (i, 0)),
        compiler_params=pltpu.CompilerParams(
            dimension_semantics=("parallel",),      # v7x: split batch across TCs
            vmem_limit_bytes=32 * 1024 * 1024,
        ),
        cost_estimate=pl.CostEstimate(
            flops=flops, transcendentals=0, bytes_accessed=bytes_accessed),
    )(x, w1, b1_2d, w2p, b2p)

    return out_padded[:B, :OUT_FEATURES]


def init_params(key):
    """Deterministic init mimicking nn.Linear default (uniform +-1/sqrt(fan_in))."""
    k1, k2, k3, k4 = jax.random.split(key, 4)
    bound1 = 1.0 / jnp.sqrt(IN_FEATURES)
    bound2 = 1.0 / jnp.sqrt(HIDDEN)
    w1 = jax.random.uniform(k1, (IN_FEATURES, HIDDEN), jnp.float32,
                            -bound1, bound1)
    b1 = jax.random.uniform(k2, (HIDDEN,), jnp.float32, -bound1, bound1)
    w2 = jax.random.uniform(k3, (HIDDEN, OUT_FEATURES), jnp.float32,
                            -bound2, bound2)
    b2 = jax.random.uniform(k4, (OUT_FEATURES,), jnp.float32, -bound2, bound2)
    return w1, b1, w2, b2


def _reference(x, w1, b1, w2, b2):
    return jnp.maximum(x @ w1 + b1, 0.0) @ w2 + b2


if __name__ == "__main__":
    key = jax.random.PRNGKey(0)
    k_params, k_x1, k_x2 = jax.random.split(key, 3)

    w1, b1, w2, b2 = init_params(k_params)
    params = prepare_params(w1, b1, w2, b2)   # one-time prep, outside forward

    # Small batch: force the Pallas path (single tile) to exercise the kernel.
    x_small = jax.random.normal(k_x1, (8, IN_FEATURES), jnp.float32)
    out_small = jax.block_until_ready(
        neural_network_q_forward(x_small, *params, min_pallas_batch=0))
    ref_small = _reference(x_small, w1, b1, w2, b2)
    assert out_small.shape == (8, OUT_FEATURES)
    assert jnp.allclose(out_small, ref_small, atol=1e-5, rtol=1e-5)

    # Mid-size batch: two balanced blocks, ragged (clipped) last block.
    x_big = jax.random.normal(k_x2, (1029, IN_FEATURES), jnp.float32)
    out_big = jax.block_until_ready(
        neural_network_q_forward(x_big, *params))
    ref_big = _reference(x_big, w1, b1, w2, b2)
    assert out_big.shape == (1029, OUT_FEATURES)
    assert jnp.allclose(out_big, ref_big, atol=1e-4, rtol=1e-4)

    print("KERNEL_OK")
</pallas_src>

<mosaic_0001>
module attributes {stable_mosaic.version = 11 : i64} {
  func.func @_mlp_kernel(%arg0: i32, %arg1: memref<8x11xf32, #tpu.memory_space<vmem>>, %arg2: memref<11x256xf32, #tpu.memory_space<vmem>>, %arg3: memref<1x256xf32, #tpu.memory_space<vmem>>, %arg4: memref<256x8xf32, #tpu.memory_space<vmem>>, %arg5: memref<1x8xf32, #tpu.memory_space<vmem>>, %arg6: memref<8x8xf32, #tpu.memory_space<vmem>>) attributes {dimension_semantics = [#tpu.dimension_semantics<parallel>], iteration_bounds = array<i64: 1>, scalar_prefetch = 0 : i64, scratch_operands = 0 : i64, tpu.core_type = #tpu.core_type<tc>, window_params = [{transform_indices = @transform_0, window_bounds = array<i64: 8, 11>}, {pipeline_mode = #tpu.pipeline_mode<synchronous>, transform_indices = @transform_1, window_bounds = array<i64: 11, 256>}, {pipeline_mode = #tpu.pipeline_mode<synchronous>, transform_indices = @transform_2, window_bounds = array<i64: 1, 256>}, {pipeline_mode = #tpu.pipeline_mode<synchronous>, transform_indices = @transform_3, window_bounds = array<i64: 256, 8>}, {pipeline_mode = #tpu.pipeline_mode<synchronous>, transform_indices = @transform_4, window_bounds = array<i64: 1, 8>}, {transform_indices = @transform_5, window_bounds = array<i64: 8, 8>}]} {
    %c0 = arith.constant 0 : index
    %c0_0 = arith.constant 0 : index
    %0 = vector.load %arg1[%c0, %c0_0] : memref<8x11xf32, #tpu.memory_space<vmem>>, vector<8x11xf32>
    %c0_1 = arith.constant 0 : index
    %c0_2 = arith.constant 0 : index
    %1 = vector.load %arg2[%c0_1, %c0_2] : memref<11x256xf32, #tpu.memory_space<vmem>>, vector<11x256xf32>
    %cst = arith.constant dense<0.000000e+00> : vector<8x256xf32>
    %2 = tpu.matmul %0, %1, %cst {dimension_numbers = #tpu.dot_dimension_numbers<[1], [0], [0], [1], [0, 0, 1, 1], [], []>} : vector<8x11xf32>, vector<11x256xf32>, vector<8x256xf32> -> vector<8x256xf32>
    %c0_3 = arith.constant 0 : index
    %c0_4 = arith.constant 0 : index
    %3 = vector.load %arg3[%c0_3, %c0_4] : memref<1x256xf32, #tpu.memory_space<vmem>>, vector<1x256xf32>
    %4 = vector.broadcast %3 : vector<1x256xf32> to vector<8x256xf32>
    %5 = arith.addf %2, %4 : vector<8x256xf32>
    %cst_5 = arith.constant 0.000000e+00 : f32
    %6 = vector.broadcast %cst_5 : f32 to vector<8x256xf32>
    %7 = arith.maximumf %5, %6 : vector<8x256xf32>
    %c0_6 = arith.constant 0 : index
    %c0_7 = arith.constant 0 : index
    %8 = vector.load %arg4[%c0_6, %c0_7] : memref<256x8xf32, #tpu.memory_space<vmem>>, vector<256x8xf32>
    %cst_8 = arith.constant dense<0.000000e+00> : vector<8x8xf32>
    %9 = tpu.matmul %7, %8, %cst_8 {dimension_numbers = #tpu.dot_dimension_numbers<[1], [0], [0], [1], [0, 0, 1, 1], [], []>} : vector<8x256xf32>, vector<256x8xf32>, vector<8x8xf32> -> vector<8x8xf32>
    %c0_9 = arith.constant 0 : index
    %c0_10 = arith.constant 0 : index
    %10 = vector.load %arg5[%c0_9, %c0_10] : memref<1x8xf32, #tpu.memory_space<vmem>>, vector<1x8xf32>
    %11 = vector.broadcast %10 : vector<1x8xf32> to vector<8x8xf32>
    %12 = arith.addf %9, %11 : vector<8x8xf32>
    %c0_11 = arith.constant 0 : index
    %c0_12 = arith.constant 0 : index
    %13 = vector.load %arg6[%c0_11, %c0_12] : memref<8x8xf32, #tpu.memory_space<vmem>>, vector<8x8xf32>
    tpu.vector_store %arg6[%c0_11, %c0_12], %12 {strides = array<i32>} : memref<8x8xf32, #tpu.memory_space<vmem>>, vector<8x8xf32>,
    return
  }
  func.func @transform_0(%arg0: i32) -> (i32, i32) {
    %c0_i32 = arith.constant 0 : i32
    %c0_i32_0 = arith.constant 0 : i32
    return %arg0, %c0_i32 : i32, i32
  }
  func.func @transform_1(%arg0: i32) -> (i32, i32) {
    %c0_i32 = arith.constant 0 : i32
    %c0_i32_0 = arith.constant 0 : i32
    %c0_i32_1 = arith.constant 0 : i32
    return %c0_i32, %c0_i32_0 : i32, i32
  }
  func.func @transform_2(%arg0: i32) -> (i32, i32) {
    %c0_i32 = arith.constant 0 : i32
    %c0_i32_0 = arith.constant 0 : i32
    %c0_i32_1 = arith.constant 0 : i32
    return %c0_i32, %c0_i32_0 : i32, i32
  }
  func.func @transform_3(%arg0: i32) -> (i32, i32) {
    %c0_i32 = arith.constant 0 : i32
    %c0_i32_0 = arith.constant 0 : i32
    %c0_i32_1 = arith.constant 0 : i32
    return %c0_i32, %c0_i32_0 : i32, i32
  }
  func.func @transform_4(%arg0: i32) -> (i32, i32) {
    %c0_i32 = arith.constant 0 : i32
    %c0_i32_0 = arith.constant 0 : i32
    %c0_i32_1 = arith.constant 0 : i32
    return %c0_i32, %c0_i32_0 : i32, i32
  }
  func.func @transform_5(%arg0: i32) -> (i32, i32) {
    %c0_i32 = arith.constant 0 : i32
    %c0_i32_0 = arith.constant 0 : i32
    return %arg0, %c0_i32 : i32, i32
  }
}

</mosaic_0001>

<bundles_post_ra>
// kernel: neural_network_q_forward.1
= control target key start
LH: loop header
LB: loop body
LE: loop exit
PB: predicated region body
PF: predicated region fallthrough
CT: control target
= control target key end

     0   :  { %vm35_vm0 = vcmask 1042432   ;;  %vm31_vm1 = vcmask 89088   ;;  %vm160_vm2 = vcmask 64512   ;;  %s321_s1 = inlined_call_operand.vmem [shape: f32[11,256], index: 1, kind: input, shape index: {}]   ;;  %s322_s0 = inlined_call_operand.vmem [shape: f32[8,11], index: 0, kind: input, shape index: {}]   ;;  %s323_s3 = inlined_call_operand.vmem [shape: f32[256,8], index: 3, kind: input, shape index: {}]   ;;  %s324_s4 = inlined_call_operand.vmem [shape: f32[1,8], index: 4, kind: input, shape index: {}]   ;;  %s325_s2 = inlined_call_operand.vmem [shape: f32[1,256], index: 2, kind: input, shape index: {}]   ;;  %s326_s5 = inlined_call_operand.vmem [shape: f32[8,8], index: 5, kind: output, shape index: {}]  }
   0x1   :  { %v23_v0 = vld [vmem:[%s321_s1 + $0x10] sm:$0x7]  ;;  %v21_v1 = vld [vmem:[%s321_s1] sm:$0xff]  ;;  %v24_v2 = vld [vmem:[%s321_s1 + $0x18] sm:$0x7] }
   0x2   :  { %166 = vmatpush.msk.msra.mxu0 %vm35_vm0, %v23_v0  ;;  %168 = vmatpush.msk.msra.mxu1 %vm35_vm0, %v24_v2  ;;  %v20_v3 = vld [vmem:[%s322_s0] sm:$0xff]  ;;  %v22_v4 = vld [vmem:[%s321_s1 + $0x8] sm:$0xff]  ;;  %v99_v5 = vld [vmem:[%s323_s3 + $0x78] sm:$0xff] }
   0x3   :  { %120 = vmatpush.msra.mxu2 %v99_v5  ;;  %v98_v6 = vld [vmem:[%s323_s3 + $0x70] sm:$0xff]  ;;  %v115_v7 = vld [vmem:[%s323_s3 + $0xf8] sm:$0xff]  ;;  %v97_v8 = vld [vmem:[%s323_s3 + $0x68] sm:$0xff] }
   0x4   :  { %57 = vmatpush.msra.mxu0 %v21_v1  ;;  %77 = vmatpush.msra.mxu1 %v22_v4  ;;  %v114_v9 = vld [vmem:[%s323_s3 + $0xf0] sm:$0xff]  ;;  %v96_v10 = vld [vmem:[%s323_s3 + $0x60] sm:$0xff]  ;;  %v113_v11 = vld [vmem:[%s323_s3 + $0xe8] sm:$0xff] }
   0x5   :  { %167 = vmatmul.msk.f32.vlgmr.msra.gmra.mxu0 %vm31_vm1, %v20_v3  ;;  %169 = vmatmul.msk.f32.vlgmr.msra.gmra.mxu1 %vm31_vm1, %v20_v3  ;;  %v95_v12 = vld [vmem:[%s323_s3 + $0x58] sm:$0xff]  ;;  %v112_v13 = vld [vmem:[%s323_s3 + $0xe0] sm:$0xff]  ;;  %v94_v14 = vld [vmem:[%s323_s3 + $0x50] sm:$0xff] }
   0x6   :  { %121 = vmatpush.msra.mxu2 %v98_v6  ;;  %140 = vmatpush.msra.mxu3 %v115_v7  ;;  %v111_v15 = vld [vmem:[%s323_s3 + $0xd8] sm:$0xff]  ;;  %v93_v16 = vld [vmem:[%s323_s3 + $0x48] sm:$0xff]  ;;  %v110_v17 = vld [vmem:[%s323_s3 + $0xd0] sm:$0xff] }
   0x7   :  { %v92_v18 = vld [vmem:[%s323_s3 + $0x40] sm:$0xff]  ;;  %v109_v19 = vld [vmem:[%s323_s3 + $0xc8] sm:$0xff]  ;;  %v91_v20 = vld [vmem:[%s323_s3 + $0x38] sm:$0xff] }
   0x8   :  { %122 = vmatpush.msra.mxu2 %v97_v8  ;;  %141 = vmatpush.msra.mxu3 %v114_v9  ;;  %v108_v21 = vld [vmem:[%s323_s3 + $0xc0] sm:$0xff]  ;;  %v90_v22 = vld [vmem:[%s323_s3 + $0x30] sm:$0xff]  ;;  %v107_v23 = vld [vmem:[%s323_s3 + $0xb8] sm:$0xff] }
   0x9   :  { %v89_v24 = vld [vmem:[%s323_s3 + $0x28] sm:$0xff]  ;;  %v106_v25 = vld [vmem:[%s323_s3 + $0xb0] sm:$0xff]  ;;  %v88_v26 = vld [vmem:[%s323_s3 + $0x20] sm:$0xff] }
   0xa   :  { %123 = vmatpush.msra.mxu2 %v96_v10  ;;  %142 = vmatpush.msra.mxu3 %v113_v11  ;;  %v105_v27 = vld [vmem:[%s323_s3 + $0xa8] sm:$0xff]  ;;  %v87_v28 = vld [vmem:[%s323_s3 + $0x18] sm:$0xff]  ;;  %v104_v29 = vld [vmem:[%s323_s3 + $0xa0] sm:$0xff] }
   0xb   :  { %v86_v30 = vld [vmem:[%s323_s3 + $0x10] sm:$0xff]  ;;  %v103_v31 = vld [vmem:[%s323_s3 + $0x98] sm:$0xff]  ;;  %v85_v32 = vld [vmem:[%s323_s3 + $0x8] sm:$0xff] }
   0xc   :  { %124 = vmatpush.msra.mxu2 %v95_v12  ;;  %143 = vmatpush.msra.mxu3 %v112_v13  ;;  %v102_v33 = vld [vmem:[%s323_s3 + $0x90] sm:$0xff]  ;;  %v84_v34 = vld [vmem:[%s323_s3] sm:$0xff]  ;;  %v101_v35 = vld [vmem:[%s323_s3 + $0x88] sm:$0xff] }
   0xd   :  { %v100_v36 = vld [vmem:[%s323_s3 + $0x80] sm:$0xff] }
   0xe   :  { %125 = vmatpush.msra.mxu2 %v94_v14  ;;  %144 = vmatpush.msra.mxu3 %v111_v15  ;;  %v25_v37 = vld [vmem:[%s325_s2] sm:$0x3] }
   0xf   :  { %v27_v38 = vperm.slane %v25_v37, 0  ;;  %v28_v39 = vperm.slane %v25_v37, 1  ;;  %v170_v46 = vld [vmem:[%s324_s4] ss:$0 sm:$0xff] }
  0x10   :  { %126 = vmatpush.msra.mxu2 %v93_v16  ;;  %145 = vmatpush.msra.mxu3 %v110_v17 }
  0x12   :  { %127 = vmatpush.msra.mxu2 %v92_v18  ;;  %146 = vmatpush.msra.mxu3 %v109_v19 }
  0x14   :  { %128 = vmatpush.msra.mxu2 %v91_v20  ;;  %147 = vmatpush.msra.mxu3 %v108_v21 }
  0x16   :  { %129 = vmatpush.msra.mxu2 %v90_v22  ;;  %148 = vmatpush.msra.mxu3 %v107_v23 }
  0x18   :  { %130 = vmatpush.msra.mxu2 %v89_v24  ;;  %149 = vmatpush.msra.mxu3 %v106_v25 }
  0x1a   :  { %131 = vmatpush.msra.mxu2 %v88_v26  ;;  %150 = vmatpush.msra.mxu3 %v105_v27 }
  0x1c   :  { %132 = vmatpush.msra.mxu2 %v87_v28  ;;  %151 = vmatpush.msra.mxu3 %v104_v29 }
  0x1e   :  { %133 = vmatpush.msra.mxu2 %v86_v30  ;;  %152 = vmatpush.msra.mxu3 %v103_v31 }
  0x20   :  { %134 = vmatpush.msra.mxu2 %v85_v32  ;;  %153 = vmatpush.msra.mxu3 %v102_v33 }
  0x22   :  { %135 = vmatpush.msra.mxu2 %v84_v34  ;;  %154 = vmatpush.msra.mxu3 %v101_v35 }
  0x24   :  { %155 = vmatpush.msra.mxu3 %v100_v36 }
  0x82   :  { %v59_v40 = vpop.f32.mrf.mxu0  ;;  %v79_v41 = vpop.f32.mrf.mxu1 }
  0x83   :  { %v60_v42 = vadd.f32 %v59_v40, %v27_v38  ;;  %v80_v43 = vadd.f32 %v79_v41, %v28_v39 }
  0x85   :  { %v82_v44 = vmax.f32 %v60_v42, 0.0  ;;  %v83_v45 = vmax.f32 %v80_v43, 0.0 }
  0x87   :  { %136 = vmatmul.f32.vlgmr.msra.gmra.mxu2 %v82_v44  ;;  %156 = vmatmul.f32.vlgmr.msra.gmra.mxu3 %v83_v45 }
 0x10a   :  { %v137_v47 = vpop.f32.mrf.mxu2  ;;  %v157_v48 = vpop.f32.mrf.mxu3 }
 0x10b   :  { %v138_v49 = vadd.f32 %v170_v46, %v137_v47 }
 0x10d   :  { %v158_v50 = vadd.f32 %v157_v48, %v138_v49 }
 0x10f   :  { %161 = vst.msk [vmem:[%s326_s5] sm:$0xff] %vm160_vm2, %v158_v50 }

</bundles_post_ra>
